<compile_context>
chip_gen: v6e
topology: v6e:2x2x1
jax: 0.10.0
libtpu: 0.0.40
codegen_flags: <defaults>
</compile_context>

<pallas_src>
import functools

import jax
import jax.numpy as jnp
import numpy as np
from jax.experimental import pallas as pl
from jax.experimental.pallas import tpu as pltpu


def _final_layer_kernel(x_ref, shift_ref, scale_ref,
                        w1_ref, b1_ref, w2_ref, b2_ref,
                        out_ref, *, eps):
    # One grid step = one (batch tile, seq tile). Everything stays in vregs.
    x = x_ref[...]                         # (bB, bN, H) f32
    shift = shift_ref[...]                 # (bB, H)     f32  (precomputed adaLN)
    scale = scale_ref[...]                 # (bB, H)     f32

    # --- LayerNorm (no affine, eps=1e-6) over the channel axis, f32 ---
    mean = jnp.mean(x, axis=-1, keepdims=True)
    xc = x - mean
    var = jnp.mean(xc * xc, axis=-1, keepdims=True)
    xn = xc * jax.lax.rsqrt(var + eps)      # rsqrt -> EUP

    # --- modulate: per-batch shift/scale broadcast over the seq axis ---
    xm = xn * (1.0 + scale[:, None, :]) + shift[:, None, :]

    # --- MLP: fc1 -> GELU(tanh) -> fc2, batch merged into sublane axis ---
    bB, bN, H = xm.shape
    xm2 = xm.reshape(bB * bN, H)            # layout no-op (bN % 8 == 0)

    # bf16 operands, f32 accumulation on the MXU; biases added in f32.
    h = jnp.dot(xm2.astype(jnp.bfloat16), w1_ref[...],
                preferred_element_type=jnp.float32) + b1_ref[...]
    h = jax.nn.gelu(h, approximate=True)    # tanh approximation (EUP), f32
    y = jnp.dot(h.astype(jnp.bfloat16), w2_ref[...],
                preferred_element_type=jnp.float32) + b2_ref[...]

    # Lane-dense store: last dim (out_pad) is a multiple of 128.
    out_ref[...] = y.reshape(bB, bN, -1).astype(out_ref.dtype)


def _pick_block_n(N, max_block=256):
    """Largest multiple-of-8 divisor of N, capped so the seq grid has >=2 steps."""
    cap = min(max_block, max(8, N // 2))
    best = None
    for b in range(8, cap + 1, 8):
        if N % b == 0:
            best = b
    return best if best is not None else N


def final_layer_pallas(x, c, params, *, block_n=None, block_b=None, eps=1e-6):
    """x: (B, N, H) f32, c: (B, H) f32 -> (B, N, out_channels) f32."""
    B, N, H = x.shape
    out_ch = params["w2"].shape[1]

    # --- adaLN branch hoisted to the wrapper (plain XLA, f32) -------------
    # shift = first half, scale = second half (matches torch.chunk(2, dim=1)).
    sc = c * jax.nn.sigmoid(c)                      # SiLU
    ada = sc @ params["w_ada"] + params["b_ada"]    # (B, 2H)
    shift, scale = ada[:, :H], ada[:, H:]

    # --- weights: bf16 for MXU; fc2 padded to a lane multiple -------------
    # (In production, pre-pad / pre-cast once outside the step function.)
    out_pad = ((out_ch + 127) // 128) * 128
    w1 = params["w1"].astype(jnp.bfloat16)
    b1 = params["b1"].reshape(1, -1).astype(jnp.float32)
    w2 = params["w2"].astype(jnp.bfloat16)
    b2 = params["b2"].reshape(1, -1).astype(jnp.float32)
    if out_pad != out_ch:
        w2 = jnp.pad(w2, ((0, 0), (0, out_pad - out_ch)))
        b2 = jnp.pad(b2, ((0, 0), (0, out_pad - out_ch)))

    # --- tiling ------------------------------------------------------------
    if block_b is None:
        block_b = B
    if block_n is None:
        block_n = _pick_block_n(N)
    assert B % block_b == 0, "batch tile must divide B"
    assert N % block_n == 0 and block_n % 8 == 0, \
        "seq tile must divide N and be a multiple of 8 (pad N if needed)"
    grid = (B // block_b, N // block_n)

    # --- generation-aware VMEM budget --------------------------------------
    try:
        vmem_cap = pltpu.get_tpu_info().vmem_capacity_bytes   # 64 MiB v7x, 128 MiB v5e/v6e
    except Exception:
        vmem_cap = 64 << 20
    vmem_limit = int(vmem_cap) * 7 // 8

    const = lambda b, i: (0, 0)
    buf1 = pl.Buffered(1)          # grid-invariant operands: single-buffer
    kernel = functools.partial(_final_layer_kernel, eps=eps)

    y = pl.pallas_call(
        kernel,
        out_shape=jax.ShapeDtypeStruct((B, N, out_pad), x.dtype),
        grid=grid,
        in_specs=[
            pl.BlockSpec((block_b, block_n, H), lambda b, i: (b, i, 0)),   # x
            pl.BlockSpec((block_b, H), lambda b, i: (b, 0)),               # shift
            pl.BlockSpec((block_b, H), lambda b, i: (b, 0)),               # scale
            pl.BlockSpec((H, H), const, pipeline_mode=buf1),               # W_fc1 (bf16)
            pl.BlockSpec((1, H), const, pipeline_mode=buf1),               # b_fc1 (f32)
            pl.BlockSpec((H, out_pad), const, pipeline_mode=buf1),         # W_fc2 (bf16, padded)
            pl.BlockSpec((1, out_pad), const, pipeline_mode=buf1),         # b_fc2 (f32, padded)
        ],
        out_specs=pl.BlockSpec((block_b, block_n, out_pad),
                               lambda b, i: (b, i, 0)),
        compiler_params=pltpu.CompilerParams(
            dimension_semantics=("parallel", "parallel"),
            vmem_limit_bytes=vmem_limit),
    )(x, shift, scale, w1, b1, w2, b2)

    return y[..., :out_ch] if out_pad != out_ch else y


def final_layer_ref(x, c, params, *, eps=1e-6):
    """Pure-JAX reference mirroring the PyTorch forward (eval mode, f32).

    Uses the same bf16-quantized fc1/fc2 weight *values* the kernel sees (the
    cast to bf16 and back is exact), but keeps all arithmetic in f32.
    """
    H = x.shape[-1]
    sc = c * jax.nn.sigmoid(c)                                  # SiLU
    ada = sc @ params["w_ada"] + params["b_ada"]
    shift, scale = ada[:, :H], ada[:, H:]                       # chunk order
    mean = x.mean(-1, keepdims=True)
    var = ((x - mean) ** 2).mean(-1, keepdims=True)
    xn = (x - mean) / jnp.sqrt(var + eps)
    xm = xn * (1.0 + scale[:, None, :]) + shift[:, None, :]
    w1 = params["w1"].astype(jnp.bfloat16).astype(jnp.float32)
    w2 = params["w2"].astype(jnp.bfloat16).astype(jnp.float32)
    h = jax.nn.gelu(xm @ w1 + params["b1"], approximate=True)
    return h @ w2 + params["b2"]


def init_params(key, hidden, out_channels):
    ks = jax.random.split(key, 6)
    s = hidden ** -0.5
    return {
        # adaLN Sequential(SiLU, Linear(H, 2H)): weight stored transposed (H, 2H)
        "w_ada": jax.random.normal(ks[0], (hidden, 2 * hidden), jnp.float32) * s,
        "b_ada": jax.random.normal(ks[1], (2 * hidden,), jnp.float32) * 0.02,
        # Mlp fc1 (H -> H) and fc2 (H -> out_channels)
        "w1": jax.random.normal(ks[2], (hidden, hidden), jnp.float32) * s,
        "b1": jax.random.normal(ks[3], (hidden,), jnp.float32) * 0.02,
        "w2": jax.random.normal(ks[4], (hidden, out_channels), jnp.float32) * s,
        "b2": jax.random.normal(ks[5], (out_channels,), jnp.float32) * 0.02,
    }


# TODO(synk): linear_output=True branch (plain Linear instead of Mlp) not
# implemented; this kernel covers the module's default (Mlp) path.

if __name__ == "__main__":
    B, N, H, OUT = 2, 32, 32, 8      # batch=2, seq=32, hidden=32, out_channels=8

    key = jax.random.PRNGKey(0)
    kx, kc, kp = jax.random.split(key, 3)
    x = jax.random.normal(kx, (B, N, H), jnp.float32)
    c = jax.random.normal(kc, (B, H), jnp.float32)
    params = init_params(kp, H, OUT)

    out = final_layer_pallas(x, c, params)       # auto block_n=16 -> grid=(1, 2)
    out = jax.block_until_ready(out)

    ref = final_layer_ref(x, c, params)
    # bf16 MXU operands (f32 accumulation) vs pure-f32 reference.
    np.testing.assert_allclose(np.asarray(out), np.asarray(ref),
                               rtol=2e-2, atol=2e-2)
    assert out.shape == (B, N, OUT)
    print("KERNEL_OK")
</pallas_src>

<mosaic_0001>
module attributes {stable_mosaic.version = 11 : i64} {
  func.func @_final_layer_kernel(%arg0: i32, %arg1: i32, %arg2: memref<2x16x32xf32, #tpu.memory_space<vmem>>, %arg3: memref<2x32xf32, #tpu.memory_space<vmem>>, %arg4: memref<2x32xf32, #tpu.memory_space<vmem>>, %arg5: memref<32x32xbf16, #tpu.memory_space<vmem>>, %arg6: memref<1x32xf32, #tpu.memory_space<vmem>>, %arg7: memref<32x128xbf16, #tpu.memory_space<vmem>>, %arg8: memref<1x128xf32, #tpu.memory_space<vmem>>, %arg9: memref<2x16x128xf32, #tpu.memory_space<vmem>>) attributes {dimension_semantics = [#tpu.dimension_semantics<parallel>, #tpu.dimension_semantics<parallel>], iteration_bounds = array<i64: 1, 2>, scalar_prefetch = 0 : i64, scratch_operands = 0 : i64, tpu.core_type = #tpu.core_type<tc>, window_params = [{transform_indices = @transform_0, window_bounds = array<i64: 2, 16, 32>}, {transform_indices = @transform_1, window_bounds = array<i64: 2, 32>}, {transform_indices = @transform_2, window_bounds = array<i64: 2, 32>}, {pipeline_mode = #tpu.pipeline_mode<synchronous>, transform_indices = @transform_3, window_bounds = array<i64: 32, 32>}, {pipeline_mode = #tpu.pipeline_mode<synchronous>, transform_indices = @transform_4, window_bounds = array<i64: 1, 32>}, {pipeline_mode = #tpu.pipeline_mode<synchronous>, transform_indices = @transform_5, window_bounds = array<i64: 32, 128>}, {pipeline_mode = #tpu.pipeline_mode<synchronous>, transform_indices = @transform_6, window_bounds = array<i64: 1, 128>}, {transform_indices = @transform_7, window_bounds = array<i64: 2, 16, 128>}]} {
    %c0 = arith.constant 0 : index
    %c0_0 = arith.constant 0 : index
    %c0_1 = arith.constant 0 : index
    %0 = vector.load %arg2[%c0, %c0_0, %c0_1] : memref<2x16x32xf32, #tpu.memory_space<vmem>>, vector<2x16x32xf32>
    %c0_2 = arith.constant 0 : index
    %c0_3 = arith.constant 0 : index
    %1 = vector.load %arg3[%c0_2, %c0_3] : memref<2x32xf32, #tpu.memory_space<vmem>>, vector<2x32xf32>
    %c0_4 = arith.constant 0 : index
    %c0_5 = arith.constant 0 : index
    %2 = vector.load %arg4[%c0_4, %c0_5] : memref<2x32xf32, #tpu.memory_space<vmem>>, vector<2x32xf32>
    %cst = arith.constant dense<0.000000e+00> : vector<2x16xf32>
    %3 = vector.multi_reduction <add>, %0, %cst [2] : vector<2x16x32xf32> to vector<2x16xf32>
    %4 = vector.shape_cast %3 : vector<2x16xf32> to vector<2x16x1xf32>
    %cst_6 = arith.constant 3.200000e+01 : f32
    %5 = vector.broadcast %cst_6 : f32 to vector<2x16x1xf32>
    %6 = arith.divf %4, %5 : vector<2x16x1xf32>
    %7 = vector.broadcast %6 : vector<2x16x1xf32> to vector<2x16x32xf32>
    %8 = arith.subf %0, %7 : vector<2x16x32xf32>
    %9 = arith.mulf %8, %8 : vector<2x16x32xf32>
    %cst_7 = arith.constant dense<0.000000e+00> : vector<2x16xf32>
    %10 = vector.multi_reduction <add>, %9, %cst_7 [2] : vector<2x16x32xf32> to vector<2x16xf32>
    %11 = vector.shape_cast %10 : vector<2x16xf32> to vector<2x16x1xf32>
    %cst_8 = arith.constant 3.200000e+01 : f32
    %12 = vector.broadcast %cst_8 : f32 to vector<2x16x1xf32>
    %13 = arith.divf %11, %12 : vector<2x16x1xf32>
    %cst_9 = arith.constant 9.99999997E-7 : f32
    %14 = vector.broadcast %cst_9 : f32 to vector<2x16x1xf32>
    %15 = arith.addf %13, %14 : vector<2x16x1xf32>
    %16 = math.rsqrt %15 : vector<2x16x1xf32>
    %17 = vector.broadcast %16 : vector<2x16x1xf32> to vector<2x16x32xf32>
    %18 = arith.mulf %8, %17 : vector<2x16x32xf32>
    %19 = vector.shape_cast %2 : vector<2x32xf32> to vector<2x1x32xf32>
    %cst_10 = arith.constant 1.000000e+00 : f32
    %20 = vector.broadcast %cst_10 : f32 to vector<2x1x32xf32>
    %21 = arith.addf %20, %19 : vector<2x1x32xf32>
    %22 = vector.broadcast %21 : vector<2x1x32xf32> to vector<2x16x32xf32>
    %23 = arith.mulf %18, %22 : vector<2x16x32xf32>
    %24 = vector.shape_cast %1 : vector<2x32xf32> to vector<2x1x32xf32>
    %25 = vector.broadcast %24 : vector<2x1x32xf32> to vector<2x16x32xf32>
    %26 = arith.addf %23, %25 : vector<2x16x32xf32>
    %27 = vector.shape_cast %26 : vector<2x16x32xf32> to vector<32x32xf32>
    %28 = arith.truncf %27 : vector<32x32xf32> to vector<32x32xbf16>
    %c0_11 = arith.constant 0 : index
    %c0_12 = arith.constant 0 : index
    %29 = vector.load %arg5[%c0_11, %c0_12] : memref<32x32xbf16, #tpu.memory_space<vmem>>, vector<32x32xbf16>
    %cst_13 = arith.constant dense<0.000000e+00> : vector<32x32xf32>
    %30 = tpu.matmul %28, %29, %cst_13 {dimension_numbers = #tpu.dot_dimension_numbers<[1], [0], [0], [1], [0, 0, 1, 1], [], []>} : vector<32x32xbf16>, vector<32x32xbf16>, vector<32x32xf32> -> vector<32x32xf32>
    %c0_14 = arith.constant 0 : index
    %c0_15 = arith.constant 0 : index
    %31 = vector.load %arg6[%c0_14, %c0_15] : memref<1x32xf32, #tpu.memory_space<vmem>>, vector<1x32xf32>
    %32 = vector.broadcast %31 : vector<1x32xf32> to vector<32x32xf32>
    %33 = arith.addf %30, %32 : vector<32x32xf32>
    %34 = arith.mulf %33, %33 : vector<32x32xf32>
    %35 = arith.mulf %33, %34 : vector<32x32xf32>
    %cst_16 = arith.constant 4.471500e-02 : f32
    %36 = vector.broadcast %cst_16 : f32 to vector<32x32xf32>
    %37 = arith.mulf %36, %35 : vector<32x32xf32>
    %38 = arith.addf %33, %37 : vector<32x32xf32>
    %cst_17 = arith.constant 0.797884583 : f32
    %39 = vector.broadcast %cst_17 : f32 to vector<32x32xf32>
    %40 = arith.mulf %39, %38 : vector<32x32xf32>
    %41 = math.tanh %40 : vector<32x32xf32>
    %cst_18 = arith.constant 1.000000e+00 : f32
    %42 = vector.broadcast %cst_18 : f32 to vector<32x32xf32>
    %43 = arith.addf %42, %41 : vector<32x32xf32>
    %cst_19 = arith.constant 5.000000e-01 : f32
    %44 = vector.broadcast %cst_19 : f32 to vector<32x32xf32>
    %45 = arith.mulf %44, %43 : vector<32x32xf32>
    %46 = arith.mulf %33, %45 : vector<32x32xf32>
    %47 = arith.truncf %46 : vector<32x32xf32> to vector<32x32xbf16>
    %c0_20 = arith.constant 0 : index
    %c0_21 = arith.constant 0 : index
    %48 = vector.load %arg7[%c0_20, %c0_21] : memref<32x128xbf16, #tpu.memory_space<vmem>>, vector<32x128xbf16>
    %cst_22 = arith.constant dense<0.000000e+00> : vector<32x128xf32>
    %49 = tpu.matmul %47, %48, %cst_22 {dimension_numbers = #tpu.dot_dimension_numbers<[1], [0], [0], [1], [0, 0, 1, 1], [], []>} : vector<32x32xbf16>, vector<32x128xbf16>, vector<32x128xf32> -> vector<32x128xf32>
    %c0_23 = arith.constant 0 : index
    %c0_24 = arith.constant 0 : index
    %50 = vector.load %arg8[%c0_23, %c0_24] : memref<1x128xf32, #tpu.memory_space<vmem>>, vector<1x128xf32>
    %51 = vector.broadcast %50 : vector<1x128xf32> to vector<32x128xf32>
    %52 = arith.addf %49, %51 : vector<32x128xf32>
    %53 = vector.shape_cast %52 : vector<32x128xf32> to vector<2x16x128xf32>
    %c0_25 = arith.constant 0 : index
    %c0_26 = arith.constant 0 : index
    %c0_27 = arith.constant 0 : index
    %54 = vector.load %arg9[%c0_25, %c0_26, %c0_27] : memref<2x16x128xf32, #tpu.memory_space<vmem>>, vector<2x16x128xf32>
    tpu.vector_store %arg9[%c0_25, %c0_26, %c0_27], %53 {strides = array<i32>} : memref<2x16x128xf32, #tpu.memory_space<vmem>>, vector<2x16x128xf32>,
    return
  }
  func.func @transform_0(%arg0: i32, %arg1: i32) -> (i32, i32, i32) {
    %c0_i32 = arith.constant 0 : i32
    %c0_i32_0 = arith.constant 0 : i32
    return %arg0, %arg1, %c0_i32 : i32, i32, i32
  }
  func.func @transform_1(%arg0: i32, %arg1: i32) -> (i32, i32) {
    %c0_i32 = arith.constant 0 : i32
    %c0_i32_0 = arith.constant 0 : i32
    return %arg0, %c0_i32 : i32, i32
  }
  func.func @transform_2(%arg0: i32, %arg1: i32) -> (i32, i32) {
    %c0_i32 = arith.constant 0 : i32
    %c0_i32_0 = arith.constant 0 : i32
    return %arg0, %c0_i32 : i32, i32
  }
  func.func @transform_3(%arg0: i32, %arg1: i32) -> (i32, i32) {
    %c0_i32 = arith.constant 0 : i32
    %c0_i32_0 = arith.constant 0 : i32
    %c0_i32_1 = arith.constant 0 : i32
    return %c0_i32, %c0_i32_0 : i32, i32
  }
  func.func @transform_4(%arg0: i32, %arg1: i32) -> (i32, i32) {
    %c0_i32 = arith.constant 0 : i32
    %c0_i32_0 = arith.constant 0 : i32
    %c0_i32_1 = arith.constant 0 : i32
    return %c0_i32, %c0_i32_0 : i32, i32
  }
  func.func @transform_5(%arg0: i32, %arg1: i32) -> (i32, i32) {
    %c0_i32 = arith.constant 0 : i32
    %c0_i32_0 = arith.constant 0 : i32
    %c0_i32_1 = arith.constant 0 : i32
    return %c0_i32, %c0_i32_0 : i32, i32
  }
  func.func @transform_6(%arg0: i32, %arg1: i32) -> (i32, i32) {
    %c0_i32 = arith.constant 0 : i32
    %c0_i32_0 = arith.constant 0 : i32
    %c0_i32_1 = arith.constant 0 : i32
    return %c0_i32, %c0_i32_0 : i32, i32
  }
  func.func @transform_7(%arg0: i32, %arg1: i32) -> (i32, i32, i32) {
    %c0_i32 = arith.constant 0 : i32
    %c0_i32_0 = arith.constant 0 : i32
    return %arg0, %arg1, %c0_i32 : i32, i32, i32
  }
}

</mosaic_0001>

<bundles_post_ra>
// kernel: tpu_custom_call.1
= control target key start
LH: loop header
LB: loop body
LE: loop exit
PB: predicated region body
PF: predicated region fallthrough
CT: control target
= control target key end

     0   :  { %s1567_s0 = inlined_call_operand.hbm [shape: f32[2,32,32], index: 0, kind: input, shape index: {}]   ;;  %s1568_s1 = inlined_call_operand.hbm [shape: f32[2,32], index: 1, kind: input, shape index: {}]   ;;  %s1569_s2 = inlined_call_operand.vmem [shape: f32[2,32], index: 2, kind: input, shape index: {}]   ;;  %s1570_s3 = inlined_call_operand.hbm [shape: bf16[32,32], index: 3, kind: input, shape index: {}]   ;;  %s1571_s4 = inlined_call_operand.vmem [shape: f32[1,32], index: 4, kind: input, shape index: {}]   ;;  %s1572_s5 = inlined_call_operand.hbm [shape: bf16[32,128], index: 5, kind: input, shape index: {}]   ;;  %s1573_s6 = inlined_call_operand.vmem [shape: f32[1,128], index: 6, kind: input, shape index: {}]   ;;  %s1574_s7 = inlined_call_operand.hbm [shape: f32[2,32,128], index: 7, kind: output, shape index: {}]  }
   0x1   :  { %1578 = sst [smem:[#allocation22_spill]] %s1568_s1 }
   0x2   :  { %1579 = sst [smem:[#allocation23_spill]] %s1570_s3 }
   0x3   :  { %1580 = sst [smem:[#allocation24_spill]] %s1572_s5 }
   0x4   :  { %12 = vsyncpa [#allocation3], 0 }
   0x5   :  { %14 = vsyncpa [#allocation3 + $0x1], 0 }
   0x6   :  { %15 = vsyncpa [#allocation6], 0 }
   0x7   :  { %16 = vsyncpa [#allocation9], 0 }
   0x8   :  { %17 = vsyncpa [#allocation4], 0 }
   0x9   :  { %19 = vsyncpa [#allocation4 + $0x1], 0  ;;  %s1325_s24 = smov 0   ;;  %s1327_s25 = smov 0  }
   0xa   :  { %s1329_s26 = smov 0   ;;  %s1331_s27 = smov 0  }
   0xb   :  { %s1333_s28 = smov 0   ;;  %s1335_s29 = smov 0  }
   0xc LB: > { %1581 = sst [smem:[#allocation20_spill]] %s1260_s28  ;;  %s925_s30 = sadd.s32 4294967295, %s1264_s29   ;;  %s1264_s29 = sphi %s1335_s29, %s25_s29   ;;  %s1260_s28 = sphi %s1333_s28, %s1596_s28   ;;  %s1256_s27 = sphi %s1331_s27, %s1595_s27   ;;  %s1252_s26 = sphi %s1329_s26, %s1599_s26   ;;  %s1248_s25 = sphi %s1327_s25, %s1598_s25   ;;  %s1244_s24 = sphi %s1325_s24, %s1597_s24  }
   0xd   : > { %s926_s8 = sadd.s32 4294967294, %s1264_s29   ;;  %s34_s9 = sadd.s32 1, %s1260_s28 }
   0xe   : > { %s46_s10 = sadd.s32 1, %s1252_s26  ;;  %p35_p0 = scmp.ge.s32.totalorder %s34_s9, 2 }
   0xf   : > { %p53_p1 = scmp.ne.s32.totalorder %s1252_s26, %s1248_s25  ;;  %p54_p2 = scmp.eq.s32.totalorder %s1264_s29, 0 }
  0x10   : > { %p59_p3 = scmp.ne.s32.totalorder %s1248_s25, %s1244_s24  ;;  %s1601_s9 = smov (%p35_p0, %s34_s9), 0 }
  0x11   : > { %1582 = sst [smem:[#allocation21_spill]] %s1601_s9  ;;  %p1366_p4 = por %p54_p2, %p53_p1 }
  0x12   : > { %p1370_p5 = scmp.eq.s32.totalorder %s925_s30, 0  ;;  %s42_s13 = ssub.s32 %s1260_s28, %s1601_s9 }
  0x13   : > { %p221_p6 = scmp.eq.s32.totalorder %s925_s30, 1  ;;  %p44_p7 = scmp.eq.s32.totalorder %s42_s13, 0 }
  0x14   : > { %p1378_p8 = por %p1370_p5, %p59_p3  ;;  %p227_p10 = scmp.eq.s32.totalorder %s926_s8, 1 }
  0x15   : > { %p1382_p9 = por %p221_p6, %p53_p1  ;;  %p927_p12 = scmp.ge.s32.totalorder %s1264_s29, 1 }
  0x16   : > { %s1387_s16 = scalar_select %p44_p7, %s1252_s26, %s46_s10  }
  0x17   : > { %s1586_s15 = scalar_select %p1382_p9, 1, 0 }
  0x18   : > { %p1389_p11 = por %p227_p10, %p59_p3  ;;  %p234_p13 = scmp.lt.s32.totalorder %s1264_s29, 3 }
  0x19   : > { %s1266_s19 = smov [#allocation5]   ;;  %s1267_s21 = smov [#allocation7]  }
  0x1a   : > { %s1587_s17 = scalar_select %p1389_p11, 1, 0 }
  0x1b   : > { %p1395_p0 = pnand %p927_p12, %p234_p13  ;;  %s249_s20 = sshll.u32 %s1266_s19, 4  ;;  %s250_s20 = int_to_ptr.vmem [resolvable:$true] %s249_s20 }
  0x1c   : > { %s266_s22 = sshll.u32 %s1267_s21, 4  ;;  %s1268_s30 = smov [#allocation8]   ;;  %s1401_s22 = int_to_ptr.vmem [resolvable:$true] %s266_s22 }
  0x1d   : > { %p1016_p1 = pneg %p1395_p0  ;;  %s282_s8 = sshll.u32 %s1268_s30, 4  ;;  %s1409_s8 = int_to_ptr.vmem [resolvable:$true] %s282_s8 }
  0x1e   : > { %s1135_s10 = scalar_lea.vmem %s250_s20, 32  ;;  %p1143_p12 = scmp.lt.s32.totalorder %s250_s20, %s250_s20 }
  0x1f   : > { %p1405_p2 = pnand %p1016_p1, %p1370_p5  ;;  %p1136_p6 = scmp.ne.s32.totalorder %s250_s20, %s1135_s10 }
  0x20   : > { %p1144_p13 = scmp.lt.s32.totalorder %s1135_s10, %s1135_s10 }
  0x21   : > { %p1126_p3 = pneg %p1405_p2 }
  0x22   : > { %p1145_p1 = por %p1144_p13, %p1143_p12 }
  0x23   : > { %p1138_p7 = pnand %p1136_p6, %p1126_p3 }
  0x25   : > { %p1139_p10 = pneg %p1138_p7 }
  0x27   : > { %p1146_p11 = pnand %p1145_p1, %p1139_p10 }
  0x29   : > { %1149 = shalt.err (!%p1146_p11)
}
  0x2a   : > { %s1590_s1 = sld [smem:[#allocation22_spill]]  ;;  %s1161_s21 = scalar_lea.vmem %s1401_s22, 256 }
  0x2b   : > { %p1162_p9 = scmp.ne.s32.totalorder %s1401_s22, %s1161_s21  ;;  %p1169_p12 = scmp.lt.s32.totalorder %s1401_s22, %s1401_s22 }
  0x2c   : > { %p1170_p10 = scmp.lt.s32.totalorder %s1161_s21, %s1161_s21 }
  0x2d   : > { %p1164_p6 = pnand %p1162_p9, %p1126_p3 }
  0x2e   : > { %p1171_p11 = por %p1170_p10, %p1169_p12 }
  0x2f   : > { %p1165_p7 = pneg %p1164_p6 }
  0x30   : > { %1019 = dma.hbm_to_vmem [thread:$0]  (!%p1405_p2), %s1590_s1, 32, %s250_s20, [#allocation6]  }
  0x31   : > { %p1172_p13 = pnand %p1171_p11, %p1165_p7 }
  0x33   : > { %1175 = shalt.err (!%p1172_p13)
}
  0x34   : > { %s1269_s30 = smov 64   ;;  %s1270_s20 = smov 4  }
  0x35   : > { %s1591_s3 = sld [smem:[#allocation23_spill]]  ;;  %s1187_s19 = scalar_lea.vmem %s1409_s8, 256 }
  0x36   : > { %p1188_p9 = scmp.ne.s32.totalorder %s1409_s8, %s1187_s19  ;;  %p1195_p7 = scmp.lt.s32.totalorder %s1409_s8, %s1409_s8 }
  0x37   : > { %p1196_p12 = scmp.lt.s32.totalorder %s1187_s19, %s1187_s19 }
  0x38   : > { %p1190_p1 = pnand %p1188_p9, %p1126_p3 }
  0x39   : > { %p1197_p10 = por %p1196_p12, %p1195_p7 }
  0x3a   : > { %p1191_p6 = pneg %p1190_p1 }
  0x3b   : > { %1022 = dma.hbm_to_vmem [thread:$0]  (!%p1405_p2), %s1591_s3, 256, %s1401_s22, [#allocation6], %s1269_s30, %s1269_s30, %s1270_s20  }
  0x3c   : > { %p1198_p11 = pnand %p1197_p10, %p1191_p6 }
  0x3e   : > { %1201 = shalt.err (!%p1198_p11)
}
  0x3f   : > { %s1592_s5 = sld [smem:[#allocation24_spill]]  ;;  %p932_p13 = scmp.ge.s32.totalorder %s1264_s29, 2 }
  0x41   : > { %295 = sbr.rel (%p932_p13) target bundleno = 83 (0x53), region = 40 }
  0x45   : > { %1025 = dma.hbm_to_vmem [thread:$0]  (!%p1405_p2), %s1592_s5, 256, %s1409_s8, [#allocation9], %s1269_s30, %s1269_s30, %s1270_s20  }
  0x46   : > { %s299_s22 = sand.u32 1, %s1252_s26   ;;  %s961_s10 = sshll.u32 %s1260_s28, 8 }
  0x47   : > { %s933_s23 = sshll.u32 %s299_s22, 5  ;;  %s312_s1 = scalar_lea.hbm %s1567_s0, %s961_s10 }
  0x48   : > { %s993_s8 = scalar_select %p1366_p4, [#allocation0], [#allocation15] }
  0x49   : > { %s303_s30 = scalar_lea.vmem [#allocation2], %s933_s23  ;;  %s1271_s3 = smov 512  }
  0x4a   : > { %s325_s20 = sshll.u32 %s303_s30, 4  ;;  %s317_s21 = sld [smem:[%s993_s8]]   ;;  %s326_s20 = int_to_ptr.vmem [resolvable:$true] %s325_s20 }
  0x4b   : > { %994 = sst [smem:[#allocation12]] (%p1366_p4), %s1271_s3  ;;  %s1272_s5 = smov 256  }
  0x4c   : > { %995 = sst [smem:[#allocation12 + $0x1]] (%p1366_p4), %s1272_s5  ;;  %s1273_s9 = smov 2  }
  0x4d   : > { %996 = sst [smem:[#allocation12 + $0x2]] (%p1366_p4), %s1273_s9  ;;  %s1274_s28 = smov 128  }
  0x4e   : > { %997 = sst [smem:[#allocation12 + $0x3]] (%p1366_p4), %s1274_s28  ;;  %s1275_s23 = smov 8  }
  0x4f   : > { %998 = sst [smem:[#allocation12 + $0x4]] (%p1366_p4), %s1274_s28  ;;  %s300_s19 = scalar_lea.sflag [#allocation3], %s299_s22 }
  0x50   : > { %s936_s10 = sshll.u32 %s317_s21, 26  ;;  %999 = sst [smem:[#allocation12 + $0x5]] (%p1366_p4), %s1275_s23 }
  0x51   : > { %s937_s13 = sadd.s32 134217728, %s936_s10  ;;  %s1276_s8 = smov 131072  }
  0x52   : > { %1000 = dma.general (%p1366_p4), %s312_s1, 512, %s326_s20, %s300_s19, %s1276_s8, [#allocation12], %s937_s13, 0  }
  0x53 PF: > { %350 = sbr.rel (%p1395_p0) target bundleno = 859 (0x35b), region = 48  ;;  %s1474_s3 = sand.u32 (!%p1395_p0), 1, %s1248_s25  }
  0x54   : > { %s939_s5 = sshll.u32 (!%p1395_p0), %s1474_s3, 5  ;;  %s353_s28 = scalar_lea.sflag (!%p1395_p0), [#allocation3], %s1474_s3 }
  0x55   : > { %s356_s9 = scalar_lea.vmem (!%p1395_p0), [#allocation2], %s939_s5 }
  0x58   : > { %1227 = dma.done.wait (%p1378_p8), %s353_s28, 512  }
  0x59   : > { %1229 = vsyncadd (%p1378_p8), %s353_s28, 4294966784 }
  0x5a   : > { %1231 = dma.done.wait (%p1370_p5), [#allocation6], 288  }
  0x5b   : > { %1233 = vsyncadd (%p1370_p5), [#allocation6], 4294967008 }
  0x5c   : > { %1235 = dma.done.wait (%p1370_p5), [#allocation9], 256  }
  0x5d   : > { %1237 = vsyncadd (%p1370_p5), [#allocation9], 4294967040  ;;  %vm418_vm0 = vcmask 261120   ;;  %v412_v0 = vld [vmem:[%s356_s9] sm:$0xff]  ;;  %v414_v1 = vld [vmem:[%s356_s9 + $0x10] sm:$0xff]  ;;  %v484_v32 = vlaneseq  ;;  %s402_s30 = scalar_lea.vmem [#allocation10], %s939_s5 }
  0x5e   : > { %v413_v2 = vld [vmem:[%s356_s9 + $0x8] sm:$0xff]  ;;  %v419_v3 = vsel %vm418_vm0, %v412_v0, 0.0  ;;  %v425_v4 = vsel %vm418_vm0, %v414_v1, 0.0  ;;  %v415_v5 = vld [vmem:[%s356_s9 + $0x18] sm:$0xff]  ;;  %v1277_v30 = vmov 1966171168  }
  0x5f   : > { %420 = vadd.xlane.f32.xlu0 %v419_v3  ;;  %426 = vadd.xlane.f32.xlu1 %v425_v4  ;;  %v422_v6 = vsel %vm418_vm0, %v413_v2, 0.0  ;;  %v428_v7 = vsel %vm418_vm0, %v415_v5, 0.0  ;;  %v1104_v28 = vld [vmem:[#allocation7 + $0x8] sm:$0xff]   ;;  %v1105_v29 = vld [vmem:[#allocation7] sm:$0xff]   ;;  %v482_v31 = vunpack.c.l.s4 %v1277_v30  ;;  %v485_v37 = vshrl.u32 %v484_v32, 7  ;;  %s753_s20 = scalar_lea.sflag [#allocation4], %s1474_s3 }
  0x60   : > { %971 = vmatprep.subr.bf16.mxu0 %v1104_v28  ;;  %v944_v46 = vld.sshfl [vmem:[%s1569_s2] sm:$0x11 pattern:$0x75316420] }
  0x61   : > { %972 = vmatpush3.bf16.msra.mxu0 %v1104_v28  ;;  %v483_v36 = vunpack.c.0.s8 %v482_v31  ;;  %v480_v49 = vcombine.high %v944_v46, %v944_v46  ;;  %v503_v53 = vsub.s32 0, %v485_v37  ;;  %v945_v54 = vld.sshfl [vmem:[#allocation5] sm:$0x11 pattern:$0x75316420] }
  0x62   : > { %973 = vmatprep.subr.bf16.mxu0 %v1105_v29  ;;  %v523_v56 = vcombine.high %v945_v54, %v945_v54 }
  0x63   : > { %423 = vadd.xlane.f32.xlu0 %v422_v6  ;;  %429 = vadd.xlane.f32.xlu1 %v428_v7  ;;  %v486_v44 = vsub.s32 %v483_v36, %v485_v37 }
  0x65   : > { %974 = vmatpush3.bf16.msra.mxu0 %v1105_v29  ;;  %v487_v50 = vrot.slane %v944_v46, %v486_v44  ;;  %v494_v51 = vrot.slane %v480_v49, %v486_v44  ;;  %v530_v60 = vrot.slane %v945_v54, %v486_v44  ;;  %v537_v62 = vrot.slane %v523_v56, %v486_v44 }
  0x67   : > { %v497_v52 = vadd.f32 1.0, %v487_v50  ;;  %v498_v58 = vadd.f32 1.0, %v494_v51  ;;  %v545_v7 = vrot.slane %v537_v62, %v503_v53 }
  0x69   : > { %v504_v59 = vrot.slane %v497_v52, %v503_v53  ;;  %v508_v3 = vrot.slane %v498_v58, %v503_v53 }
  0xe8   : > { %v421_v8 = vpop.xlane.xlu0 %420  ;;  %v427_v9 = vpop.xlane.xlu1 %426 }
  0xe9   : > { %v432_v10 = vmul.f32 0.03125, %v421_v8  ;;  %v434_v11 = vmul.f32 0.03125, %v427_v9 }
  0xeb   : > { %v436_v12 = vsub.f32 %v412_v0, %v432_v10  ;;  %v1496_v13 = vsub.f32 %v414_v1, %v434_v11 }
  0xec   : > { %v424_v14 = vpop.xlane.xlu0 %423  ;;  %v430_v15 = vpop.xlane.xlu1 %429 }
  0xed   : > { %v433_v16 = vmul.f32 0.03125, %v424_v14  ;;  %v435_v17 = vmul.f32 0.03125, %v430_v15  ;;  %v440_v18 = vmul.f32 %v436_v12, %v436_v12  ;;  %v442_v19 = vmul.f32 %v1496_v13, %v1496_v13 }
  0xef   : > { %v437_v20 = vsub.f32 %v413_v2, %v433_v16  ;;  %v1500_v21 = vsub.f32 %v415_v5, %v435_v17  ;;  %v444_v22 = vsel %vm418_vm0, %v440_v18, 0.0  ;;  %v450_v23 = vsel %vm418_vm0, %v442_v19, 0.0  ;;  %v1106_v18 = vld [vmem:[#allocation8 + $0x8] sm:$0xff]  }
  0xf0   : > { %445 = vadd.xlane.f32.xlu0 %v444_v22  ;;  %v541_v2 = vrot.slane %v530_v60, %v503_v53  ;;  %979 = vmatprep.subr.bf16.mxu1 %v1106_v18  ;;  %v946_v19 = vld [vmem:[%s1571_s4] ss:$0 sm:$0xff] }
  0xf1   : > { %v441_v24 = vmul.f32 %v437_v20, %v437_v20  ;;  %v443_v25 = vmul.f32 %v1500_v21, %v1500_v21  ;;  %980 = vmatpush3.bf16.msra.mxu1 %v1106_v18 }
  0xf3   : > { %v447_v26 = vsel %vm418_vm0, %v441_v24, 0.0  ;;  %v453_v27 = vsel %vm418_vm0, %v443_v25, 0.0 }
  0xf4   : > { %451 = vadd.xlane.f32.xlu0 %v450_v23  ;;  %448 = vadd.xlane.f32.xlu1 %v447_v26 }
  0xf8   : > { %454 = vadd.xlane.f32.xlu1 %v453_v27 }
 0x179   : > { %v446_v33 = vpop.xlane.xlu0 %445 }
 0x17a   : > { %v456_v34 = vmul.f32 0.03125, %v446_v33 }
 0x17c   : > { %v460_v35 = vadd.f32 1e-06, %v456_v34 }
 0x17d   : > { %v449_v38 = vpop.xlane.xlu1 %448  ;;  %v452_v39 = vpop.xlane.xlu0 %451 }
 0x17e   : > { %1108 = vrsqrt.f32 %v460_v35  ;;  %v457_v40 = vmul.f32 0.03125, %v449_v38  ;;  %v458_v41 = vmul.f32 0.03125, %v452_v39 }
 0x180   : > { %v461_v42 = vadd.f32 1e-06, %v457_v40  ;;  %v462_v43 = vadd.f32 1e-06, %v458_v41 }
 0x181   : > { %v455_v45 = vpop.xlane.xlu1 %454 }
 0x182   : > { %1110 = vrsqrt.f32 %v461_v42  ;;  %v459_v47 = vmul.f32 0.03125, %v455_v45 }
 0x183   : > { %1112 = vrsqrt.f32 %v462_v43 }
 0x184   : > { %v463_v48 = vadd.f32 1e-06, %v459_v47 }
 0x186   : > { %1114 = vrsqrt.f32 %v463_v48 }
 0x18b   : > { %v1109_v55 = vpop.eup %1108 }
 0x18c   : > { %v468_v57 = vmul.f32 %v1109_v55, %v436_v12 }
 0x18e   : > { %v511_v1 = vmul.f32 %v504_v59, %v468_v57 }
 0x18f   : > { %v1111_v61 = vpop.eup %1110 }
 0x190   : > { %v1113_v63 = vpop.eup %1112  ;;  %v469_v0 = vmul.f32 %v1111_v61, %v437_v20  ;;  %v548_v8 = vadd.f32 %v541_v2, %v511_v1 }
 0x191   : > { %v470_v4 = vmul.f32 %v1113_v63, %v1496_v13  ;;  %v1107_v13 = vld [vmem:[#allocation8] sm:$0xff]  }
 0x192   : > { %v512_v5 = vmul.f32 %v504_v59, %v469_v0  ;;  %981 = vmatprep.subr.bf16.mxu1 %v1107_v13 }
 0x193   : > { %v1115_v6 = vpop.eup %1114  ;;  %v513_v11 = vmul.f32 %v508_v3, %v470_v4  ;;  %982 = vmatpush3.bf16.msra.mxu1 %v1107_v13 }
 0x194   : > { %v549_v9 = vadd.f32 %v541_v2, %v512_v5  ;;  %v471_v10 = vmul.f32 %v1115_v6, %v1500_v21  ;;  %v951_v2 = vld [vmem:[%s1573_s6] ss:$0 sm:$0xff] }
 0x195   : > { %v550_v15 = vadd.f32 %v545_v7, %v513_v11 }
 0x196   : > { %v552_v12 = vpack.c.bf16 %v549_v9, %v548_v8  ;;  %v514_v14 = vmul.f32 %v508_v3, %v471_v10 }
 0x198   : > { %975 = vmatprep.mubr.msk.bf16.mxu0 %vm418_vm0, %v552_v12  ;;  %v551_v16 = vadd.f32 %v545_v7, %v514_v14 }
 0x19a   : > { %v553_v17 = vpack.c.bf16 %v551_v16, %v550_v15 }
 0x19c   : > { %976 = vmatmul.mubr.msk.bf16.vlgmr.msra.gmra.mxu0 %vm418_vm0, %v553_v17 }
 0x25c   : > { %v977_v20 = vpop.f32.mrf.mxu0 }
 0x25d   : > { %v626_v21 = vadd.f32 %v977_v20, %v946_v19 }
 0x25e   : > { %v617_v22 = vpop.f32.mrf.mxu0 }
 0x25f   : > { %v634_v23 = vmul.f32 %v626_v21, %v626_v21  ;;  %v618_v24 = vadd.f32 %v946_v19, %v617_v22 }
 0x260   : > { %v978_v25 = vpop.f32.mrf.mxu0 }
 0x261   : > { %v638_v26 = vmul.f32 %v634_v23, %v626_v21  ;;  %v632_v27 = vmul.f32 %v618_v24, %v618_v24  ;;  %v629_v28 = vadd.f32 %v978_v25, %v946_v19 }
 0x262   : > { %v620_v29 = vpop.f32.mrf.mxu0 }
 0x263   : > { %v642_v30 = vmul.f32 0.044715, %v638_v26  ;;  %v636_v31 = vmul.f32 %v632_v27, %v618_v24  ;;  %v635_v32 = vmul.f32 %v629_v28, %v629_v28  ;;  %v621_v33 = vadd.f32 %v946_v19, %v620_v29 }
 0x265   : > { %v646_v34 = vadd.f32 %v642_v30, %v626_v21  ;;  %v640_v35 = vmul.f32 0.044715, %v636_v31  ;;  %v639_v36 = vmul.f32 %v635_v32, %v629_v28  ;;  %v633_v37 = vmul.f32 %v621_v33, %v621_v33 }
 0x267   : > { %v650_v38 = vmul.f32 0.7978846, %v646_v34  ;;  %v644_v39 = vadd.f32 %v640_v35, %v618_v24  ;;  %v643_v40 = vmul.f32 0.044715, %v639_v36  ;;  %v637_v41 = vmul.f32 %v633_v37, %v621_v33 }
 0x269   : > { %v648_v42 = vmul.f32 0.7978846, %v644_v39  ;;  %v647_v43 = vadd.f32 %v643_v40, %v629_v28  ;;  %v641_v44 = vmul.f32 0.044715, %v637_v41  ;;  %1116 = vtanh.f32 %v650_v38 }
 0x26b   : > { %v651_v45 = vmul.f32 0.7978846, %v647_v43  ;;  %v645_v46 = vadd.f32 %v641_v44, %v621_v33  ;;  %1118 = vtanh.f32 %v648_v42 }
 0x26d   : > { %1120 = vtanh.f32 %v651_v45  ;;  %v649_v47 = vmul.f32 0.7978846, %v645_v46 }
 0x26f   : > { %1122 = vtanh.f32 %v649_v47 }
 0x276   : > { %v1117_v48 = vpop.eup %1116 }
 0x277   : > { %v658_v52 = vadd.f32 1.0, %v1117_v48 }
 0x278   : > { %v1119_v49 = vpop.eup %1118 }
 0x279   : > { %v656_v50 = vadd.f32 1.0, %v1119_v49  ;;  %v662_v58 = vmul.f32 0.5, %v658_v52 }
 0x27a   : > { %v1121_v51 = vpop.eup %1120 }
 0x27b   : > { %v659_v53 = vadd.f32 1.0, %v1121_v51  ;;  %v660_v57 = vmul.f32 0.5, %v656_v50  ;;  %v666_v63 = vmul.f32 %v662_v58, %v626_v21 }
 0x27c   : > { %v1123_v54 = vpop.eup %1122 }
 0x27d   : > { %v663_v55 = vmul.f32 0.5, %v659_v53  ;;  %v657_v56 = vadd.f32 1.0, %v1123_v54  ;;  %v664_v61 = vmul.f32 %v660_v57, %v618_v24 }
 0x27f   : > { %v661_v59 = vmul.f32 0.5, %v657_v56  ;;  %v667_v60 = vmul.f32 %v663_v55, %v629_v28 }
 0x281   : > { %v665_v62 = vmul.f32 %v661_v59, %v621_v33  ;;  %v669_v1 = vpack.c.bf16 %v667_v60, %v666_v63 }
 0x283   : > { %v668_v0 = vpack.c.bf16 %v665_v62, %v664_v61 }
 0x285   : > { %983 = vmatprep.mubr.msk.bf16.mxu1 %vm418_vm0, %v668_v0 }
 0x286   : > { %984 = vmatmul.mubr.msk.bf16.vlgmr.msra.gmra.mxu1 %vm418_vm0, %v669_v1 }
 0x346   : > { %v985_v3 = vpop.f32.mrf.mxu1 }
 0x347   : > { %v742_v4 = vadd.f32 %v985_v3, %v951_v2 }
 0x348   : > { %v733_v5 = vpop.f32.mrf.mxu1 }
 0x349   : > { %750 = vst [vmem:[%s402_s30 + $0x10] sm:$0xff] %v742_v4  ;;  %v734_v6 = vadd.f32 %v951_v2, %v733_v5 }
 0x34a   : > { %v986_v7 = vpop.f32.mrf.mxu1 }
 0x34b   : > { %748 = vst [vmem:[%s402_s30] sm:$0xff] %v734_v6  ;;  %v745_v8 = vadd.f32 %v986_v7, %v951_v2 }
 0x34c   : > { %v736_v9 = vpop.f32.mrf.mxu1 }
 0x34d   : > { %751 = vst [vmem:[%s402_s30 + $0x18] sm:$0xff] %v745_v8  ;;  %v737_v10 = vadd.f32 %v951_v2, %v736_v9 }
 0x34f   : > { %749 = vst [vmem:[%s402_s30 + $0x8] sm:$0xff] %v737_v10 }
 0x350   : > { %s962_s21 = sshll.u32 %s1256_s27, 8  ;;  %s779_s10 = sshll.u32 %s402_s30, 4  ;;  %s780_s10 = int_to_ptr.vmem [resolvable:$true] %s779_s10 }
 0x351   : > { %s768_s19 = scalar_lea.hbm %s1574_s7, %s962_s21  ;;  %s1278_s8 = smov 256  }
 0x352   : > { %p1593_p4 = scmp.ne.s32.totalorder %s1586_s15, 0  ;;  %s1279_s5 = smov 512  }
 0x353   : > { %s1280_s3 = smov 2   ;;  %s1281_s28 = smov 128  }
 0x354   : > { %1008 = sst [smem:[#allocation14]] (%p1593_p4), %s1278_s8  ;;  %s1282_s27 = smov 8  }
 0x355   : > { %1009 = sst [smem:[#allocation14 + $0x1]] (%p1593_p4), %s1279_s5  ;;  %s1283_s9 = smov 131072  }
 0x356   : > { %1010 = sst [smem:[#allocation14 + $0x2]] (%p1593_p4), %s1280_s3  ;;  %s1284_s11 = smov 0  }
 0x357   : > { %1011 = sst [smem:[#allocation14 + $0x3]] (%p1593_p4), %s1281_s28 }
 0x358   : > { %1012 = sst [smem:[#allocation14 + $0x4]] (%p1593_p4), %s1281_s28 }
 0x359   : > { %1013 = sst [smem:[#allocation14 + $0x5]] (%p1593_p4), %s1282_s27 }
 0x35a   : > { %1014 = dma.general (%p1593_p4), %s780_s10, 512, %s768_s19, %s753_s20, %s1283_s9, [#allocation14], %s1284_s11, 0  }
 0x35b PF: > { %s807_s12 = sand.u32 1, %s1244_s24   ;;  %p1594_p5 = scmp.ne.s32.totalorder %s1587_s17, 0 }
 0x35c   : > { %s808_s14 = scalar_lea.sflag [#allocation4], %s807_s12 }
 0x35d   : > { %p1027_p8 = pnand %p932_p13, %p1594_p5 }
 0x35f   : > { %p1028_p0 = pneg %p1027_p8 }
 0x361   : > { %1239 = dma.done.wait (%p1028_p0), %s808_s14, 512  }
 0x362   : > { %1241 = vsyncadd (%p1028_p0), %s808_s14, 4294966784  ;;  %s25_s29 = sadd.s32 1, %s1264_s29   ;;  %s1595_s27 = sld [smem:[#allocation20_spill]] }
 0x363   : > { %p22_p2 = scmp.ge.s32.totalorder %s25_s29, 4   ;;  %s1596_s28 = sld [smem:[#allocation21_spill]] }
 0x364   : > { %s1597_s24 = smov %s1248_s25  ;;  %s1598_s25 = smov %s1252_s26 }
 0x365   : > { %s1599_s26 = smov %s1387_s16  ;;  %24 = sbr.rel (!%p22_p2) target bundleno = 12 (0xc), region = 119 }
 0x36a   :  { %813 = vsyncpa [#allocation3], 1 }
 0x36b   :  { %815 = vsyncpa [#allocation3 + $0x1], 1 }
 0x36c   :  { %816 = vsyncpa [#allocation6], 1 }
 0x36d   :  { %817 = vsyncpa [#allocation9], 1 }
 0x36e   :  { %818 = vsyncpa [#allocation4], 1 }
 0x36f   :  { %820 = vsyncpa [#allocation4 + $0x1], 1 }

</bundles_post_ra>
